<compile_context>
chip_gen: v7x
topology: tpu7x:2x2x1
jax: 0.10.0
libtpu: 0.0.40
codegen_flags: <defaults>
</compile_context>

<pallas_src>
import functools

import jax
import jax.numpy as jnp
from jax.experimental import pallas as pl
from jax.experimental.pallas import tpu as pltpu

_LANE = 128


def _round_up(x, m):
    return ((x + m - 1) // m) * m


def _fused_decoder_kernel(emb_ref, noise_ref, *rest, dilations, seq_len,
                          batch_tile, emb_size, latent_size):
    """Fused BasicCNNDecoder forward for one batch tile.

    emb_ref:   [TB, S, E]   f32  target-sequence embeddings
    noise_ref: [TB, 1, L]   f32  latent code
    rest = (w_0, b_0, ..., w_{n-1}, b_{n-1}, out_ref,
            pad_0, ..., pad_{n-1}, stage_0, ..., stage_{n-1}):
      w_l:     [3*C_in_pad_l, C_out_pad_l]   bf16  im2col-reshaped conv weights
      b_l:     [1, C_out_pad_l]              f32
      out_ref: [TB, S, C_out_pad_last]       f32
      pad_l:   [TB, S + 2*dil_l, C_in_pad_l] bf16  causal-padded activations
      stage_l: [TB*S, 3*C_in_pad_l]          bf16  im2col staging slab
    """
    n_layers = len(dilations)
    w_refs = [rest[2 * l] for l in range(n_layers)]
    b_refs = [rest[2 * l + 1] for l in range(n_layers)]
    out_ref = rest[2 * n_layers]
    scratch = rest[2 * n_layers + 1:]
    pad_refs = scratch[:n_layers]
    stage_refs = scratch[n_layers:2 * n_layers]

    rows = batch_tile * seq_len

    x = None  # bf16 [TB, S, C_prev_pad] activation of the previous layer
    for layer in range(n_layers):
        dil = dilations[layer]
        halo = 2 * dil
        pad_ref = pad_refs[layer]
        stage_ref = stage_refs[layer]
        c_in = pad_ref.shape[-1]

        # Causal left padding: zero the halo rows every step (megacore-safe;
        # a program_id==0 guard would skip cores that never see step 0).
        pad_ref[:, 0:halo, :] = jnp.zeros((batch_tile, halo, c_in), jnp.bfloat16)

        if layer == 0:
            # Fused concat([embedding, broadcast(noise), channel-pad zeros]) written
            # straight into the bf16 padded scratch (no XLA concat / pad in HBM).
            zpad = c_in - emb_size - latent_size
            pieces = [
                emb_ref[...],
                jnp.broadcast_to(noise_ref[...],
                                 (batch_tile, seq_len, latent_size)),
            ]
            if zpad > 0:
                pieces.append(
                    jnp.zeros((batch_tile, seq_len, zpad), jnp.float32))
            cat = jnp.concatenate(pieces, axis=-1)
            pad_ref[:, halo:, :] = cat.astype(jnp.bfloat16)
        else:
            pad_ref[:, halo:, :] = x

        # im2col: tap k reads x_leftpad[t + k*dil]; stage into a contiguous slab
        # so the conv becomes ONE lane-dense big-K matmul.
        for k in range(3):
            tap = pad_ref[:, k * dil:k * dil + seq_len, :]
            stage_ref[:, k * c_in:(k + 1) * c_in] = tap.reshape(rows, c_in)

        w_ref = w_refs[layer]            # [3*c_in, c_out_pad] bf16
        c_out = w_ref.shape[-1]
        acc = jnp.dot(stage_ref[...], w_ref[...],
                      preferred_element_type=jnp.float32)
        acc = acc + b_refs[layer][...]
        y = jnp.maximum(acc, 0.0)

        if layer == n_layers - 1:
            out_ref[...] = y.reshape(batch_tile, seq_len, c_out).astype(
                out_ref.dtype)
        else:
            x = y.reshape(batch_tile, seq_len, c_out).astype(jnp.bfloat16)


def _pick_batch_tile_and_vmem(batch, seq_len, emb, lat, c_in_pads, c_out_pads,
                              dilations, target_rows=8192,
                              vmem_budget=44 * (1 << 20)):
    """Largest TB such that TB*S <= target_rows, VMEM estimate <= budget, and
    the grid keeps >= 2 steps when batch >= 2 (so both v7x TensorCores work)."""

    def est(tb):
        rows = tb * seq_len
        b = 0
        # Double-buffered pipelined operands.
        b += 2 * rows * emb * 4                 # embedding block
        b += 2 * tb * lat * 4                   # noise block
        b += 2 * rows * c_out_pads[-1] * 4      # output block
        for cin, cout, d in zip(c_in_pads, c_out_pads, dilations):
            b += 2 * (3 * cin * cout * 2 + cout * 4)     # weights + bias blocks
            b += tb * (seq_len + 2 * d) * cin * 2        # bf16 pad scratch
            b += rows * 3 * cin * 2                      # bf16 im2col scratch
        # Headroom for compiler temporaries (f32 acc, ReLU, casts).
        b += 2 * rows * max(c_out_pads) * 4
        return b

    tb_max = max(1, min(batch, target_rows // max(seq_len, 1)))
    if batch >= 2:
        tb_max = min(tb_max, -(-batch // 2))    # grid >= 2 steps
    tb = 1
    for cand in range(1, tb_max + 1):
        if est(cand) <= vmem_budget:
            tb = cand
        else:
            break
    vmem_limit = int(min(56 * (1 << 20),
                         max(est(tb) + (8 << 20), 16 * (1 << 20))))
    return tb, vmem_limit


def fused_cnn_decoder_forward(decoder_input, noise, kernels, biases, dilations,
                              c_last):
    """decoder_input: [B, S, E] f32, noise: [B, L] f32 -> [B, S, c_last] f32."""
    B, S, E = decoder_input.shape
    L = noise.shape[-1]
    c_in_pads = [int(w.shape[0]) // 3 for w in kernels]
    c_out_pads = [int(w.shape[1]) for w in kernels]

    TB, vmem_limit = _pick_batch_tile_and_vmem(B, S, E, L, c_in_pads,
                                               c_out_pads, dilations)
    B_pad = _round_up(B, TB)
    if B_pad != B:
        decoder_input = jnp.pad(decoder_input,
                                ((0, B_pad - B), (0, 0), (0, 0)))
        noise = jnp.pad(noise, ((0, B_pad - B), (0, 0)))
    noise3 = noise.reshape(B_pad, 1, L)

    in_specs = [
        pl.BlockSpec((TB, S, E), lambda i: (i, 0, 0)),
        pl.BlockSpec((TB, 1, L), lambda i: (i, 0, 0)),
    ]
    operands = [decoder_input, noise3]
    for w, b in zip(kernels, biases):
        in_specs.append(pl.BlockSpec(tuple(w.shape), lambda i: (0, 0)))
        in_specs.append(pl.BlockSpec(tuple(b.shape), lambda i: (0, 0)))
        operands.append(w)
        operands.append(b)

    scratch_shapes = (
        [pltpu.VMEM((TB, S + 2 * d, cin), jnp.bfloat16)
         for d, cin in zip(dilations, c_in_pads)]
        + [pltpu.VMEM((TB * S, 3 * cin), jnp.bfloat16) for cin in c_in_pads]
    )

    kernel = functools.partial(
        _fused_decoder_kernel,
        dilations=tuple(dilations),
        seq_len=S,
        batch_tile=TB,
        emb_size=E,
        latent_size=L,
    )

    out = pl.pallas_call(
        kernel,
        out_shape=jax.ShapeDtypeStruct((B_pad, S, c_out_pads[-1]),
                                       decoder_input.dtype),
        grid_spec=pltpu.PrefetchScalarGridSpec(
            num_scalar_prefetch=0,
            grid=(B_pad // TB,),
            in_specs=in_specs,
            out_specs=pl.BlockSpec((TB, S, c_out_pads[-1]),
                                   lambda i: (i, 0, 0)),
            scratch_shapes=scratch_shapes,
        ),
        compiler_params=pltpu.CompilerParams(
            dimension_semantics=("parallel",),
            vmem_limit_bytes=vmem_limit,
        ),
    )(*operands)

    # Strip batch padding and the 128-lane channel padding.
    return out[:B, :, :c_last]


class BasicCNNDecoderPallas:
    """JAX/Pallas re-implementation of textbox BasicCNNDecoder (eval mode)."""

    def __init__(self, input_size, latent_size, decoder_kernel_size,
                 decoder_dilations, dropout_ratio, key):
        if isinstance(decoder_kernel_size, int):
            decoder_kernel_size = [decoder_kernel_size]
        assert len(decoder_kernel_size) <= 3
        assert len(decoder_dilations) >= len(decoder_kernel_size)
        self.input_size = input_size
        self.latent_size = latent_size
        self.decoder_kernel_size = list(decoder_kernel_size)
        self.decoder_dilations = list(decoder_dilations)[:len(decoder_kernel_size)]
        self.dropout_ratio = dropout_ratio

        # torch layout [C_out, C_in, 3]; stored for the kernel as a 128-padded,
        # im2col-reshaped [3*C_in_pad, C_out_pad] bf16 matrix (MXU RHS).
        # Weights are bf16 in the kernel -> numerics differ from f32 torch at ~1e-3.
        self.torch_kernels = []   # f32 [out, in, 3] (reference / torch layout)
        self.torch_biases = []    # f32 [out]
        self.kernels = []         # bf16 [3*c_in_pad, c_out_pad]
        self.biases = []          # f32 [1, c_out_pad]
        for i, out_ch in enumerate(self.decoder_kernel_size):
            in_ch = (latent_size + input_size) if i == 0 \
                else self.decoder_kernel_size[i - 1]
            key, k_w, k_b = jax.random.split(key, 3)
            w = 0.05 * jax.random.normal(k_w, (out_ch, in_ch, 3), jnp.float32)
            b = 0.05 * jax.random.normal(k_b, (out_ch,), jnp.float32)
            self.torch_kernels.append(w)
            self.torch_biases.append(b)

            c_in_pad = _round_up(in_ch, _LANE)
            c_out_pad = _round_up(out_ch, _LANE)
            w_t = jnp.transpose(w, (2, 1, 0))                 # [3, in, out]
            w_p = jnp.zeros((3, c_in_pad, c_out_pad), jnp.float32)
            w_p = w_p.at[:, :in_ch, :out_ch].set(w_t)         # zero-padded rows/cols
            self.kernels.append(
                w_p.reshape(3 * c_in_pad, c_out_pad).astype(jnp.bfloat16))
            b_p = jnp.zeros((1, c_out_pad), jnp.float32).at[0, :out_ch].set(b)
            self.biases.append(b_p)
        self.paddings = [2 * d for d in self.decoder_dilations]

    def forward(self, decoder_input, noise):
        """decoder_input: [B, S, E], noise: [B, latent] -> [B, S, C_last]."""
        # TODO(synk): nn.Dropout is identity in eval mode; training-mode dropout not modeled.
        return fused_cnn_decoder_forward(
            decoder_input, noise, self.kernels, self.biases,
            self.decoder_dilations, self.decoder_kernel_size[-1])


def _reference_forward(dec, decoder_input, noise):
    """Pure-JAX reference written from the torch conv1d semantics (bf16 weights)."""
    B, S, _ = decoder_input.shape
    z = jnp.broadcast_to(noise[:, None, :], (B, S, noise.shape[-1]))
    x = jnp.concatenate([decoder_input, z], axis=2)
    for layer in range(len(dec.torch_kernels)):
        d = dec.decoder_dilations[layer]
        # Same bf16 weight quantization as the kernel.
        w = dec.torch_kernels[layer].astype(jnp.bfloat16).astype(jnp.float32)
        b = dec.torch_biases[layer]
        out_ch = w.shape[0]
        xp = jnp.pad(x, ((0, 0), (2 * d, 0), (0, 0)))   # causal left pad
        y = jnp.zeros((B, S, out_ch), jnp.float32)
        for k in range(3):
            tap = xp[:, k * d:k * d + S, :].astype(jnp.bfloat16).astype(jnp.float32)
            y = y + jnp.einsum('bsc,oc->bso', tap, w[:, :, k],
                               preferred_element_type=jnp.float32)
        y = y + b
        x = jnp.maximum(y, 0.0)
    return x


if __name__ == "__main__":
    # Small, forward-consistent shapes: B=2, S=8, embedding=32, latent=16,
    # decoder_kernel_size=[64, 64], dilations=[1, 2].
    key = jax.random.PRNGKey(0)
    k_params, k_inp, k_noise = jax.random.split(key, 3)

    input_size = 32
    latent_size = 16
    decoder_kernel_size = [64, 64]
    decoder_dilations = [1, 2]
    dropout_ratio = 0.0

    dec = BasicCNNDecoderPallas(input_size, latent_size, decoder_kernel_size,
                                decoder_dilations, dropout_ratio, k_params)

    B, S = 2, 8
    decoder_input = jax.random.normal(k_inp, (B, S, input_size), jnp.float32)
    noise = jax.random.normal(k_noise, (B, latent_size), jnp.float32)

    out = dec.forward(decoder_input, noise)
    out = jax.block_until_ready(out)

    ref = _reference_forward(dec, decoder_input, noise)
    assert out.shape == (B, S, decoder_kernel_size[-1]), out.shape
    assert jnp.allclose(out, ref, rtol=5e-3, atol=5e-3), "mismatch vs reference"

    print("KERNEL_OK")
</pallas_src>

<mosaic_0001>
module attributes {stable_mosaic.version = 11 : i64} {
  func.func @_fused_decoder_kernel(%arg0: i32, %arg1: memref<1x8x32xf32, #tpu.memory_space<vmem>>, %arg2: memref<1x1x16xf32, #tpu.memory_space<vmem>>, %arg3: memref<384x128xbf16, #tpu.memory_space<vmem>>, %arg4: memref<1x128xf32, #tpu.memory_space<vmem>>, %arg5: memref<384x128xbf16, #tpu.memory_space<vmem>>, %arg6: memref<1x128xf32, #tpu.memory_space<vmem>>, %arg7: memref<1x8x128xf32, #tpu.memory_space<vmem>>, %arg8: memref<1x10x128xbf16, #tpu.memory_space<vmem>>, %arg9: memref<1x12x128xbf16, #tpu.memory_space<vmem>>, %arg10: memref<8x384xbf16, #tpu.memory_space<vmem>>, %arg11: memref<8x384xbf16, #tpu.memory_space<vmem>>) attributes {dimension_semantics = [#tpu.dimension_semantics<parallel>], iteration_bounds = array<i64: 2>, scalar_prefetch = 0 : i64, scratch_operands = 4 : i64, tpu.core_type = #tpu.core_type<tc>, window_params = [{transform_indices = @transform_0, window_bounds = array<i64: 1, 8, 32>}, {transform_indices = @transform_1, window_bounds = array<i64: 1, 1, 16>}, {pipeline_mode = #tpu.pipeline_mode<synchronous>, transform_indices = @transform_2, window_bounds = array<i64: 384, 128>}, {pipeline_mode = #tpu.pipeline_mode<synchronous>, transform_indices = @transform_3, window_bounds = array<i64: 1, 128>}, {pipeline_mode = #tpu.pipeline_mode<synchronous>, transform_indices = @transform_4, window_bounds = array<i64: 384, 128>}, {pipeline_mode = #tpu.pipeline_mode<synchronous>, transform_indices = @transform_5, window_bounds = array<i64: 1, 128>}, {transform_indices = @transform_6, window_bounds = array<i64: 1, 8, 128>}]} {
    %cst = arith.constant 0.000000e+00 : bf16
    %0 = vector.broadcast %cst : bf16 to vector<1x2x128xbf16>
    %c0 = arith.constant 0 : index
    %c0_0 = arith.constant 0 : index
    %c0_1 = arith.constant 0 : index
    %1 = vector.load %arg8[%c0, %c0_0, %c0_1] : memref<1x10x128xbf16, #tpu.memory_space<vmem>>, vector<1x2x128xbf16>
    tpu.vector_store %arg8[%c0, %c0_0, %c0_1], %0 {strides = array<i32>} : memref<1x10x128xbf16, #tpu.memory_space<vmem>>, vector<1x2x128xbf16>,
    %c0_2 = arith.constant 0 : index
    %c0_3 = arith.constant 0 : index
    %c0_4 = arith.constant 0 : index
    %2 = vector.load %arg1[%c0_2, %c0_3, %c0_4] : memref<1x8x32xf32, #tpu.memory_space<vmem>>, vector<1x8x32xf32>
    %c0_5 = arith.constant 0 : index
    %c0_6 = arith.constant 0 : index
    %c0_7 = arith.constant 0 : index
    %3 = vector.load %arg2[%c0_5, %c0_6, %c0_7] : memref<1x1x16xf32, #tpu.memory_space<vmem>>, vector<1x1x16xf32>
    %4 = vector.shape_cast %3 : vector<1x1x16xf32> to vector<1x1x16xf32>
    %5 = vector.broadcast %4 : vector<1x1x16xf32> to vector<1x8x16xf32>
    %cst_8 = arith.constant 0.000000e+00 : f32
    %6 = vector.broadcast %cst_8 : f32 to vector<1x8x80xf32>
    %7 = tpu.concatenate %2, %5, %6 in 2 : vector<1x8x32xf32>, vector<1x8x16xf32>, vector<1x8x80xf32> -> vector<1x8x128xf32>
    %8 = arith.truncf %7 : vector<1x8x128xf32> to vector<1x8x128xbf16>
    %c0_9 = arith.constant 0 : index
    %c2 = arith.constant 2 : index
    %c0_10 = arith.constant 0 : index
    %9 = vector.load %arg8[%c0_9, %c2, %c0_10] : memref<1x10x128xbf16, #tpu.memory_space<vmem>>, vector<1x8x128xbf16>
    tpu.vector_store %arg8[%c0_9, %c2, %c0_10], %8 {strides = array<i32>} : memref<1x10x128xbf16, #tpu.memory_space<vmem>>, vector<1x8x128xbf16>,
    %c0_11 = arith.constant 0 : index
    %c0_12 = arith.constant 0 : index
    %c0_13 = arith.constant 0 : index
    %10 = vector.load %arg8[%c0_11, %c0_12, %c0_13] : memref<1x10x128xbf16, #tpu.memory_space<vmem>>, vector<1x8x128xbf16>
    %11 = vector.shape_cast %10 : vector<1x8x128xbf16> to vector<8x128xbf16>
    %c0_14 = arith.constant 0 : index
    %c0_15 = arith.constant 0 : index
    %12 = vector.load %arg10[%c0_14, %c0_15] : memref<8x384xbf16, #tpu.memory_space<vmem>>, vector<8x128xbf16>
    tpu.vector_store %arg10[%c0_14, %c0_15], %11 {strides = array<i32>} : memref<8x384xbf16, #tpu.memory_space<vmem>>, vector<8x128xbf16>,
    %c0_16 = arith.constant 0 : index
    %c1 = arith.constant 1 : index
    %c0_17 = arith.constant 0 : index
    %13 = vector.load %arg8[%c0_16, %c1, %c0_17] : memref<1x10x128xbf16, #tpu.memory_space<vmem>>, vector<1x8x128xbf16>
    %14 = vector.shape_cast %13 : vector<1x8x128xbf16> to vector<8x128xbf16>
    %c0_18 = arith.constant 0 : index
    %c128 = arith.constant 128 : index
    %15 = vector.load %arg10[%c0_18, %c128] : memref<8x384xbf16, #tpu.memory_space<vmem>>, vector<8x128xbf16>
    tpu.vector_store %arg10[%c0_18, %c128], %14 {strides = array<i32>} : memref<8x384xbf16, #tpu.memory_space<vmem>>, vector<8x128xbf16>,
    %c0_19 = arith.constant 0 : index
    %c2_20 = arith.constant 2 : index
    %c0_21 = arith.constant 0 : index
    %16 = vector.load %arg8[%c0_19, %c2_20, %c0_21] : memref<1x10x128xbf16, #tpu.memory_space<vmem>>, vector<1x8x128xbf16>
    %17 = vector.shape_cast %16 : vector<1x8x128xbf16> to vector<8x128xbf16>
    %c0_22 = arith.constant 0 : index
    %c256 = arith.constant 256 : index
    %18 = vector.load %arg10[%c0_22, %c256] : memref<8x384xbf16, #tpu.memory_space<vmem>>, vector<8x128xbf16>
    tpu.vector_store %arg10[%c0_22, %c256], %17 {strides = array<i32>} : memref<8x384xbf16, #tpu.memory_space<vmem>>, vector<8x128xbf16>,
    %c0_23 = arith.constant 0 : index
    %c0_24 = arith.constant 0 : index
    %19 = vector.load %arg10[%c0_23, %c0_24] : memref<8x384xbf16, #tpu.memory_space<vmem>>, vector<8x384xbf16>
    %c0_25 = arith.constant 0 : index
    %c0_26 = arith.constant 0 : index
    %20 = vector.load %arg3[%c0_25, %c0_26] : memref<384x128xbf16, #tpu.memory_space<vmem>>, vector<384x128xbf16>
    %cst_27 = arith.constant dense<0.000000e+00> : vector<8x128xf32>
    %21 = tpu.matmul %19, %20, %cst_27 {dimension_numbers = #tpu.dot_dimension_numbers<[1], [0], [0], [1], [0, 0, 1, 1], [], []>} : vector<8x384xbf16>, vector<384x128xbf16>, vector<8x128xf32> -> vector<8x128xf32>
    %c0_28 = arith.constant 0 : index
    %c0_29 = arith.constant 0 : index
    %22 = vector.load %arg4[%c0_28, %c0_29] : memref<1x128xf32, #tpu.memory_space<vmem>>, vector<1x128xf32>
    %23 = vector.broadcast %22 : vector<1x128xf32> to vector<8x128xf32>
    %24 = arith.addf %21, %23 : vector<8x128xf32>
    %cst_30 = arith.constant 0.000000e+00 : f32
    %25 = vector.broadcast %cst_30 : f32 to vector<8x128xf32>
    %26 = arith.maximumf %24, %25 : vector<8x128xf32>
    %27 = vector.shape_cast %26 : vector<8x128xf32> to vector<1x8x128xf32>
    %28 = arith.truncf %27 : vector<1x8x128xf32> to vector<1x8x128xbf16>
    %cst_31 = arith.constant 0.000000e+00 : bf16
    %29 = vector.broadcast %cst_31 : bf16 to vector<1x4x128xbf16>
    %c0_32 = arith.constant 0 : index
    %c0_33 = arith.constant 0 : index
    %c0_34 = arith.constant 0 : index
    %30 = vector.load %arg9[%c0_32, %c0_33, %c0_34] : memref<1x12x128xbf16, #tpu.memory_space<vmem>>, vector<1x4x128xbf16>
    tpu.vector_store %arg9[%c0_32, %c0_33, %c0_34], %29 {strides = array<i32>} : memref<1x12x128xbf16, #tpu.memory_space<vmem>>, vector<1x4x128xbf16>,
    %c0_35 = arith.constant 0 : index
    %c4 = arith.constant 4 : index
    %c0_36 = arith.constant 0 : index
    %31 = vector.load %arg9[%c0_35, %c4, %c0_36] : memref<1x12x128xbf16, #tpu.memory_space<vmem>>, vector<1x8x128xbf16>
    tpu.vector_store %arg9[%c0_35, %c4, %c0_36], %28 {strides = array<i32>} : memref<1x12x128xbf16, #tpu.memory_space<vmem>>, vector<1x8x128xbf16>,
    %c0_37 = arith.constant 0 : index
    %c0_38 = arith.constant 0 : index
    %c0_39 = arith.constant 0 : index
    %32 = vector.load %arg9[%c0_37, %c0_38, %c0_39] : memref<1x12x128xbf16, #tpu.memory_space<vmem>>, vector<1x8x128xbf16>
    %33 = vector.shape_cast %32 : vector<1x8x128xbf16> to vector<8x128xbf16>
    %c0_40 = arith.constant 0 : index
    %c0_41 = arith.constant 0 : index
    %34 = vector.load %arg11[%c0_40, %c0_41] : memref<8x384xbf16, #tpu.memory_space<vmem>>, vector<8x128xbf16>
    tpu.vector_store %arg11[%c0_40, %c0_41], %33 {strides = array<i32>} : memref<8x384xbf16, #tpu.memory_space<vmem>>, vector<8x128xbf16>,
    %c0_42 = arith.constant 0 : index
    %c2_43 = arith.constant 2 : index
    %c0_44 = arith.constant 0 : index
    %35 = vector.load %arg9[%c0_42, %c2_43, %c0_44] : memref<1x12x128xbf16, #tpu.memory_space<vmem>>, vector<1x8x128xbf16>
    %36 = vector.shape_cast %35 : vector<1x8x128xbf16> to vector<8x128xbf16>
    %c0_45 = arith.constant 0 : index
    %c128_46 = arith.constant 128 : index
    %37 = vector.load %arg11[%c0_45, %c128_46] : memref<8x384xbf16, #tpu.memory_space<vmem>>, vector<8x128xbf16>
    tpu.vector_store %arg11[%c0_45, %c128_46], %36 {strides = array<i32>} : memref<8x384xbf16, #tpu.memory_space<vmem>>, vector<8x128xbf16>,
    %c0_47 = arith.constant 0 : index
    %c4_48 = arith.constant 4 : index
    %c0_49 = arith.constant 0 : index
    %38 = vector.load %arg9[%c0_47, %c4_48, %c0_49] : memref<1x12x128xbf16, #tpu.memory_space<vmem>>, vector<1x8x128xbf16>
    %39 = vector.shape_cast %38 : vector<1x8x128xbf16> to vector<8x128xbf16>
    %c0_50 = arith.constant 0 : index
    %c256_51 = arith.constant 256 : index
    %40 = vector.load %arg11[%c0_50, %c256_51] : memref<8x384xbf16, #tpu.memory_space<vmem>>, vector<8x128xbf16>
    tpu.vector_store %arg11[%c0_50, %c256_51], %39 {strides = array<i32>} : memref<8x384xbf16, #tpu.memory_space<vmem>>, vector<8x128xbf16>,
    %c0_52 = arith.constant 0 : index
    %c0_53 = arith.constant 0 : index
    %41 = vector.load %arg11[%c0_52, %c0_53] : memref<8x384xbf16, #tpu.memory_space<vmem>>, vector<8x384xbf16>
    %c0_54 = arith.constant 0 : index
    %c0_55 = arith.constant 0 : index
    %42 = vector.load %arg5[%c0_54, %c0_55] : memref<384x128xbf16, #tpu.memory_space<vmem>>, vector<384x128xbf16>
    %cst_56 = arith.constant dense<0.000000e+00> : vector<8x128xf32>
    %43 = tpu.matmul %41, %42, %cst_56 {dimension_numbers = #tpu.dot_dimension_numbers<[1], [0], [0], [1], [0, 0, 1, 1], [], []>} : vector<8x384xbf16>, vector<384x128xbf16>, vector<8x128xf32> -> vector<8x128xf32>
    %c0_57 = arith.constant 0 : index
    %c0_58 = arith.constant 0 : index
    %44 = vector.load %arg6[%c0_57, %c0_58] : memref<1x128xf32, #tpu.memory_space<vmem>>, vector<1x128xf32>
    %45 = vector.broadcast %44 : vector<1x128xf32> to vector<8x128xf32>
    %46 = arith.addf %43, %45 : vector<8x128xf32>
    %cst_59 = arith.constant 0.000000e+00 : f32
    %47 = vector.broadcast %cst_59 : f32 to vector<8x128xf32>
    %48 = arith.maximumf %46, %47 : vector<8x128xf32>
    %49 = vector.shape_cast %48 : vector<8x128xf32> to vector<1x8x128xf32>
    %c0_60 = arith.constant 0 : index
    %c0_61 = arith.constant 0 : index
    %c0_62 = arith.constant 0 : index
    %50 = vector.load %arg7[%c0_60, %c0_61, %c0_62] : memref<1x8x128xf32, #tpu.memory_space<vmem>>, vector<1x8x128xf32>
    tpu.vector_store %arg7[%c0_60, %c0_61, %c0_62], %49 {strides = array<i32>} : memref<1x8x128xf32, #tpu.memory_space<vmem>>, vector<1x8x128xf32>,
    return
  }
  func.func @transform_0(%arg0: i32) -> (i32, i32, i32) {
    %c0_i32 = arith.constant 0 : i32
    %c0_i32_0 = arith.constant 0 : i32
    %c0_i32_1 = arith.constant 0 : i32
    return %arg0, %c0_i32, %c0_i32_0 : i32, i32, i32
  }
  func.func @transform_1(%arg0: i32) -> (i32, i32, i32) {
    %c0_i32 = arith.constant 0 : i32
    %c0_i32_0 = arith.constant 0 : i32
    %c0_i32_1 = arith.constant 0 : i32
    return %arg0, %c0_i32, %c0_i32_0 : i32, i32, i32
  }
  func.func @transform_2(%arg0: i32) -> (i32, i32) {
    %c0_i32 = arith.constant 0 : i32
    %c0_i32_0 = arith.constant 0 : i32
    %c0_i32_1 = arith.constant 0 : i32
    return %c0_i32, %c0_i32_0 : i32, i32
  }
  func.func @transform_3(%arg0: i32) -> (i32, i32) {
    %c0_i32 = arith.constant 0 : i32
    %c0_i32_0 = arith.constant 0 : i32
    %c0_i32_1 = arith.constant 0 : i32
    return %c0_i32, %c0_i32_0 : i32, i32
  }
  func.func @transform_4(%arg0: i32) -> (i32, i32) {
    %c0_i32 = arith.constant 0 : i32
    %c0_i32_0 = arith.constant 0 : i32
    %c0_i32_1 = arith.constant 0 : i32
    return %c0_i32, %c0_i32_0 : i32, i32
  }
  func.func @transform_5(%arg0: i32) -> (i32, i32) {
    %c0_i32 = arith.constant 0 : i32
    %c0_i32_0 = arith.constant 0 : i32
    %c0_i32_1 = arith.constant 0 : i32
    return %c0_i32, %c0_i32_0 : i32, i32
  }
  func.func @transform_6(%arg0: i32) -> (i32, i32, i32) {
    %c0_i32 = arith.constant 0 : i32
    %c0_i32_0 = arith.constant 0 : i32
    %c0_i32_1 = arith.constant 0 : i32
    return %arg0, %c0_i32, %c0_i32_0 : i32, i32, i32
  }
}

</mosaic_0001>

<bundles_post_ra>
// kernel: tpu_custom_call.1
= control target key start
LH: loop header
LB: loop body
LE: loop exit
PB: predicated region body
PF: predicated region fallthrough
CT: control target
= control target key end

     0   :  { %11 = vsyncpa [#allocation7], 0  ;;  %s1894_s0 = inlined_call_operand.hbm [shape: f32[2,8,32], index: 0, kind: input, shape index: {}]   ;;  %s1895_s1 = inlined_call_operand.vmem [shape: f32[2,1,16], index: 1, kind: input, shape index: {}]   ;;  %s1896_s2 = inlined_call_operand.hbm [shape: bf16[384,128], index: 2, kind: input, shape index: {}]   ;;  %s1897_s3 = inlined_call_operand.vmem [shape: f32[1,128], index: 3, kind: input, shape index: {}]   ;;  %s1898_s4 = inlined_call_operand.hbm [shape: bf16[384,128], index: 4, kind: input, shape index: {}]   ;;  %s1899_s5 = inlined_call_operand.vmem [shape: f32[1,128], index: 5, kind: input, shape index: {}]   ;;  %s1900_s6 = inlined_call_operand.hbm [shape: f32[2,8,128], index: 6, kind: output, shape index: {}]  }
   0x1   :  { %13 = vsyncpa [#allocation7 + $0x1], 0 }
   0x2   :  { %14 = vsyncpa [#allocation10], 0 }
   0x3   :  { %15 = vsyncpa [#allocation8], 0 }
   0x4   :  { %17 = vsyncpa [#allocation8 + $0x1], 0  ;;  %s1619_s21 = smov 0   ;;  %s1621_s22 = smov 0  }
   0x5   :  { %s1623_s23 = smov 0   ;;  %s1625_s24 = smov 0  }
   0x6 LB: > { %s1640_s25 = sadd.s32 4294967295, %s1572_s24   ;;  %s1107_s26 = sadd.s32 4294967294, %s1572_s24   ;;  %s1572_s24 = sphi %s1625_s24, %s1922_s24   ;;  %s1568_s23 = sphi %s1623_s23, %s1921_s23   ;;  %s1564_s22 = sphi %s1621_s22, %s1920_s22   ;;  %s1560_s21 = sphi %s1619_s21, %s1919_s21  }
   0x7   : > { %p43_p0 = scmp.ne.s32.totalorder %s1564_s22, %s1560_s21  ;;  %p1901_p1 = scmp.eq.s32.totalorder %s1640_s25, 0 }
   0x8   : > { %p183_p3 = scmp.eq.s32.totalorder %s1107_s26, 1  ;;  %p1108_p5 = scmp.ge.s32.totalorder %s1572_s24, 1 }
   0x9   : > { %p1649_p4 = por %p1901_p1, %p43_p0  ;;  %p190_p7 = scmp.lt.s32.totalorder %s1572_s24, 3 }
   0xa   : > { %p1654_p6 = por %p183_p3, %p43_p0  ;;  %s1574_s30 = smov [#allocation9]  }
   0xb   : > { %s1904_s27 = scalar_select %p1649_p4, 1, 0 }
   0xc   : > { %s1905_s28 = scalar_select %p1654_p6, 1, 0 }
   0xd   : > { %p1659_p8 = pnand %p1108_p5, %p190_p7  ;;  %s202_s7 = sshll.u32 %s1574_s30, 4  ;;  %s1663_s7 = int_to_ptr.vmem [resolvable:$true] %s202_s7 }
   0xe   : > { %s1575_s9 = smov [#allocation11]   ;;  %s1416_s13 = scalar_lea.hbm %s1896_s2, 3072 }
   0xf   : > { %p1301_p9 = pneg %p1659_p8  ;;  %s218_s10 = sshll.u32 %s1575_s9, 4  ;;  %s1674_s10 = int_to_ptr.vmem [resolvable:$true] %s218_s10 }
  0x10   : > { %p1417_p12 = scmp.ne.s32.totalorder %s1896_s2, %s1416_s13  ;;  %p1423_p5 = scmp.lt.u32.totalorder %s1416_s13, %s1896_s2 }
  0x11   : > { %p1670_p11 = pnand %p1301_p9, %p1901_p1 }
  0x13   : > { %p1418_p13 = pneg %p1670_p11 }
  0x15   : > { %p1419_p0 = pnand %p1418_p13, %p1417_p12 }
  0x17   : > { %p1420_p3 = pneg %p1419_p0 }
  0x19   : > { %p1425_p7 = pnand %p1423_p5, %p1420_p3 }
  0x1b   : > { %1428 = shalt.err (!%p1425_p7)
}
  0x1c   : > { %s1429_s18 = scalar_lea.vmem %s1663_s7, 3072  ;;  %p1437_p2 = scmp.lt.s32.totalorder %s1663_s7, %s1663_s7 }
  0x1d   : > { %p1430_p9 = scmp.ne.s32.totalorder %s1663_s7, %s1429_s18  ;;  %p1438_p12 = scmp.lt.s32.totalorder %s1429_s18, %s1429_s18 }
  0x1f   : > { %p1432_p10 = pnand %p1430_p9, %p1418_p13  ;;  %p1439_p0 = por %p1438_p12, %p1437_p2 }
  0x21   : > { %p1433_p1 = pneg %p1432_p10 }
  0x23   : > { %p1440_p6 = pnand %p1439_p0, %p1433_p1 }
  0x25   : > { %1443 = shalt.err (!%p1440_p6)
}
  0x26   : > { %s1576_s19 = smov 64   ;;  %s1577_s20 = smov 4  }
  0x27   : > { %1304 = dma.hbm_to_vmem [thread:$0]  (!%p1670_p11), %s1896_s2, 3072, %s1663_s7, [#allocation10], %s1576_s19, %s1576_s19, %s1577_s20  }
  0x28   : > { %s1444_s12 = scalar_lea.hbm %s1898_s4, 3072 }
  0x29   : > { %p1445_p2 = scmp.ne.s32.totalorder %s1898_s4, %s1444_s12  ;;  %p1451_p10 = scmp.lt.u32.totalorder %s1444_s12, %s1898_s4 }
  0x2b   : > { %p1447_p1 = pnand %p1445_p2, %p1418_p13 }
  0x2d   : > { %p1448_p6 = pneg %p1447_p1 }
  0x2f   : > { %p1453_p3 = pnand %p1451_p10, %p1448_p6 }
  0x31   : > { %1456 = shalt.err (!%p1453_p3)
}
  0x32   : > { %s1457_s7 = scalar_lea.vmem %s1674_s10, 3072  ;;  %p1465_p12 = scmp.lt.s32.totalorder %s1674_s10, %s1674_s10 }
  0x33   : > { %p1458_p5 = scmp.ne.s32.totalorder %s1674_s10, %s1457_s7  ;;  %p1466_p0 = scmp.lt.s32.totalorder %s1457_s7, %s1457_s7 }
  0x35   : > { %p1460_p7 = pnand %p1458_p5, %p1418_p13  ;;  %p1467_p2 = por %p1466_p0, %p1465_p12 }
  0x37   : > { %p1461_p9 = pneg %p1460_p7 }
  0x39   : > { %p1468_p1 = pnand %p1467_p2, %p1461_p9 }
  0x3b   : > { %1471 = shalt.err (!%p1468_p1)
}
  0x3c   : > { %1307 = dma.hbm_to_vmem [thread:$0]  (!%p1670_p11), %s1898_s4, 3072, %s1674_s10, [#allocation10], %s1576_s19, %s1576_s19, %s1577_s20  }
  0x3d   : > { %s1729_s26 = sadd.s32 1, %s1572_s24   ;;  %s30_s8 = sadd.s32 1, %s1568_s23 }
  0x3e   : > { %s27_s30 = ssub.s32 %s1572_s24, %s1729_s26  ;;  %p37_p13 = scmp.ne.s32.totalorder %s1568_s23, %s1564_s22 }
  0x3f   : > { %p28_p6 = scmp.eq.s32.totalorder %s27_s30, 0  ;;  %p38_p10 = scmp.eq.s32.totalorder %s1572_s24, 0 }
  0x40   : > { %p1908_p3 = scmp.eq.s32.totalorder %s1640_s25, 1  ;;  %p1318_p7 = scmp.lt.s32.totalorder %s1572_s24, 2 }
  0x41   : > { %s1745_s11 = scalar_select %p28_p6, %s1568_s23, %s30_s8  }
  0x42   : > { %p1739_p5 = por %p1908_p3, %p37_p13  ;;  %p39_p9 = por %p38_p10, %p37_p13 }
  0x43   : > { %s235_s12 = sand.u32 1, %s1568_s23   ;;  %s1113_s10 = sshll.u32 %s1572_s24, 7 }
  0x44   : > { %s1909_s9 = scalar_select %p1739_p5, 1, 0 }
  0x45   : > { %s1112_s13 = sshll.u32 %s235_s12, 3  ;;  %s1752_s14 = scalar_lea.hbm %s1894_s0, %s1113_s10 }
  0x46   : > { %s239_s15 = scalar_lea.vmem [#allocation6], %s1112_s13  ;;  %p1756_p11 = pnand %p1318_p7, %p39_p9 }
  0x47   : > { %s246_s16 = sshll.u32 %s239_s15, 4  ;;  %s236_s17 = scalar_lea.sflag [#allocation7], %s235_s12  ;;  %s1754_s16 = int_to_ptr.vmem [resolvable:$true] %s246_s16 }
  0x48   : > { %s1472_s18 = scalar_lea.hbm %s1752_s14, 128  ;;  %p1474_p0 = pneg %p1756_p11 }
  0x49   : > { %p1473_p12 = scmp.ne.s32.totalorder %s1752_s14, %s1472_s18  ;;  %s1477_s13 = scalar_lea.hbm %s1894_s0, 256 }
  0x4a   : > { %p1478_p13 = scmp.lt.u32.totalorder %s1752_s14, %s1894_s0  ;;  %p1479_p6 = scmp.lt.u32.totalorder %s1477_s13, %s1472_s18 }
  0x4b   : > { %p1475_p2 = pnand %p1474_p0, %p1473_p12  ;;  %p1481_p3 = scmp.lt.u32.totalorder %s1472_s18, %s1752_s14 }
  0x4c   : > { %p1480_p10 = por %p1479_p6, %p1478_p13 }
  0x4d   : > { %p1476_p1 = pneg %p1475_p2 }
  0x4e   : > { %p1482_p7 = por %p1481_p3, %p1480_p10 }
  0x50   : > { %p1483_p9 = pnand %p1482_p7, %p1476_p1 }
  0x52   : > { %1486 = shalt.err (!%p1483_p9)
}
  0x53   : > { %s1487_s12 = scalar_lea.vmem %s1754_s16, 128  ;;  %s1578_s20 = smov [#allocation6]  }
  0x54   : > { %p1488_p12 = scmp.ne.s32.totalorder %s1754_s16, %s1487_s12  ;;  %s1492_s15 = sshll.u32 %s1578_s20, 4  ;;  %s1493_s15 = int_to_ptr.vmem [resolvable:$false] %s1492_s15 }
  0x55   : > { %s1494_s8 = scalar_lea.vmem %s1493_s15, 256  ;;  %p1495_p4 = scmp.lt.s32.totalorder %s1754_s16, %s1493_s15 }
  0x56   : > { %p1490_p2 = pnand %p1488_p12, %p1474_p0  ;;  %p1496_p13 = scmp.lt.s32.totalorder %s1494_s8, %s1487_s12 }
  0x58   : > { %p1491_p5 = pneg %p1490_p2  ;;  %p1497_p6 = por %p1496_p13, %p1495_p4 }
  0x5a   : > { %p1498_p10 = pnand %p1497_p6, %p1491_p5 }
  0x5c   : > { %1501 = shalt.err (!%p1498_p10)
}
  0x5d   : > { %1311 = dma.hbm_to_vmem [thread:$0]  (!%p1756_p11), %s1752_s14, 128, %s1754_s16, %s236_s17  }
  0x5e   : > { %261 = sbr.rel (%p1659_p8) target bundleno = 744 (0x2e8), region = 44  ;;  %s1788_s18 = sand.u32 (!%p1659_p8), 1, %s1564_s22  }
  0x5f   : > { %s1115_s30 = sshll.u32 (!%p1659_p8), %s1788_s18, 3  ;;  %s264_s13 = scalar_lea.sflag (!%p1659_p8), [#allocation7], %s1788_s18 }
  0x60   : > { %s1794_s10 = scalar_lea.vmem (!%p1659_p8), [#allocation6], %s1115_s30  ;;  %p1911_p4 = scmp.ne.s32.totalorder (!%p1659_p8), %s1904_s27, 0 }
  0x65   : > { %1547 = dma.done.wait (%p1911_p4), %s264_s13, 128  }
  0x66   : > { %1549 = vsyncadd (%p1911_p4), %s264_s13, 4294967168  ;;  %p1912_p5 = scmp.eq.s32.totalorder %s1640_s25, 0 }
  0x68   : > { %1551 = dma.done.wait (%p1912_p5), [#allocation10], 6144   ;;  %p1913_p8 = pmov %p1912_p5 }
  0x69   : > { %p307_p11 = scmp.lt.s32.totalorder %s1640_s25, 1  ;;  %v1579_v0 = vmov 0.0   ;;  %v1580_v1 = vmov 0   ;;  %s1581_s7 = smov 32   ;;  %v1362_v3 = vld [vmem:[#allocation9 + $0x80] sm:$0xff]   ;;  %v1364_v5 = vld [vmem:[#allocation9 + $0x88] sm:$0xff]  }
  0x6a   : > { %1553 = vsyncadd (%p1913_p8), [#allocation10], 4294961152  ;;  %1249 = vmatprep.subr.bf16.mxu1 %v1579_v0  ;;  %311 = vst [vmem:[#allocation2] sm:$0x1] %v1580_v1  ;;  %v1363_v4 = vld [vmem:[#allocation9 + $0x40] sm:$0xff]   ;;  %v1366_v7 = vld [vmem:[#allocation9 + $0x48] sm:$0xff]  }
  0x6b   : > { %666 = vst [vmem:[#allocation3] sm:$0x3] %v1580_v1  ;;  %s308_s29 = scalar_select %p307_p11, %s1640_s25, 1  ;;  %1250 = vmatpush3.bf16.msra.mxu1 %v1362_v3  ;;  %1187 = vmatprep.subr.bf16.mxu0 %v1363_v4  ;;  %v1365_v6 = vld [vmem:[#allocation9] sm:$0xff]   ;;  %vm1582_vm0 = vmmov 0   ;;  %v1367_v8 = vld [vmem:[#allocation9 + $0x90] sm:$0xff]  }
  0x6c   : > { %1251 = vmatprep.subr.bf16.mxu1 %v1579_v0  ;;  %1265 = vmatprep.mubr.msk.bf16.mxu1 %vm1582_vm0, %v1579_v0  ;;  %v1368_v9 = vld [vmem:[#allocation9 + $0x8] sm:$0xff]   ;;  %v1369_v10 = vld [vmem:[#allocation9 + $0x50] sm:$0xff]   ;;  %v1370_v11 = vld [vmem:[#allocation9 + $0x98] sm:$0xff]   ;;  %vm322_vm1 = vcmask 261120   ;;  %vm324_vm2 = vcmask 392192   ;;  %vm363_vm3 = vcmask 1042432  }
  0x6d   : > { %s309_s27 = scalar_lea.vmem %s1895_s1, %s308_s29  ;;  %1188 = vmatpush3.bf16.msra.mxu0 %v1365_v6  ;;  %v1371_v12 = vld [vmem:[#allocation9 + $0x10] sm:$0xff]   ;;  %v1372_v13 = vld [vmem:[#allocation9 + $0x58] sm:$0xff]   ;;  %v1373_v14 = vld [vmem:[#allocation9 + $0xa0] sm:$0xff]   ;;  %vm364_vm4 = vcmask 1046532   ;;  %vm340_vm5 = vsmask.f32 3328 }
  0x6e   : > { %v1119_v2 = vld [vmem:[%s309_s27] ss:$0 sm:$0xff]  ;;  %1189 = vmatprep.subr.bf16.mxu0 %v1366_v7  ;;  %v1374_v15 = vld [vmem:[#allocation9 + $0x18] sm:$0xff]   ;;  %v1375_v16 = vld [vmem:[#allocation9 + $0x60] sm:$0xff]   ;;  %vm341_vm6 = vsmask.f32 7440 }
  0x6f   : > { %319 = vrot.lane.b32.xlu0 %v1119_v2, %s1581_s7  ;;  %1252 = vmatpush3.bf16.msra.mxu1 %v1364_v5  ;;  %v1376_v17 = vld [vmem:[#allocation9 + $0xa8] sm:$0xff]   ;;  %v1377_v18 = vld [vmem:[#allocation9 + $0x20] sm:$0xff]   ;;  %v1379_v20 = vld [vmem:[#allocation9 + $0xb0] sm:$0xff]   ;;  %vm692_vm9 = vcmask 1041408   ;;  %vm693_vm10 = vcmask 1045508   ;;  %s1182_s15 = sshll.u32 %s1640_s25, 7 }
  0x70   : > { %1253 = vmatprep.subr.bf16.mxu1 %v1579_v0  ;;  %v1378_v19 = vld [vmem:[#allocation9 + $0x68] sm:$0xff]   ;;  %v1381_v22 = vld [vmem:[#allocation9 + $0x70] sm:$0xff]   ;;  %v1382_v23 = vld [vmem:[#allocation9 + $0xb8] sm:$0xff]   ;;  %s306_s8 = scalar_lea.vmem [#allocation12], %s1115_s30  ;;  %s1850_s14 = scalar_lea.hbm %s1900_s6, %s1182_s15 }
  0x71   : > { %1190 = vmatpush3.bf16.msra.mxu0 %v1368_v9  ;;  %v1380_v21 = vld [vmem:[#allocation9 + $0x28] sm:$0xff]   ;;  %v1383_v24 = vld [vmem:[#allocation9 + $0x30] sm:$0xff]   ;;  %v1385_v25 = vld [vmem:[#allocation9 + $0x78] sm:$0xff]   ;;  %s1009_s13 = sshll.u32 %s306_s8, 4  ;;  %s996_s16 = scalar_lea.sflag [#allocation8], %s1788_s18  ;;  %s1852_s13 = int_to_ptr.vmem [resolvable:$true] %s1009_s13 }
  0x72   : > { %1191 = vmatprep.subr.bf16.mxu0 %v1369_v10  ;;  %v1386_v26 = vld [vmem:[#allocation9 + $0x38] sm:$0xff]   ;;  %vm1821_vm7 = vmor %vm363_vm3, %vm364_vm4  ;;  %v1390_v56 = vld [vmem:[#allocation11 + $0x80] sm:$0xff]   ;;  %s1502_s27 = scalar_lea.vmem %s1852_s13, 128  ;;  %p1916_p1 = scmp.ne.s32.totalorder %s1909_s9, 0 }
  0x73   : > { %1254 = vmatpush3.bf16.msra.mxu1 %v1367_v8  ;;  %v312_v27 = vld [vmem:[%s1794_s10] sm:$0xff]  ;;  %vm342_vm8 = vmor %vm340_vm5, %vm341_vm6  ;;  %v1389_v57 = vld [vmem:[#allocation11 + $0x40] sm:$0xff]   ;;  %p1503_p0 = scmp.ne.s32.totalorder %s1852_s13, %s1502_s27  ;;  %s1583_s25 = smov [#allocation12]  }
  0x74   : > { %1255 = vmatprep.subr.bf16.mxu1 %v1579_v0  ;;  %v1391_v58 = vld [vmem:[#allocation11] sm:$0xff]   ;;  %v1393_v59 = vld [vmem:[#allocation11 + $0x88] sm:$0xff]   ;;  %v1396_v62 = vld [vmem:[#allocation11 + $0x90] sm:$0xff]   ;;  %s1506_s30 = sshll.u32 %s1583_s25, 4  ;;  %s1507_s30 = int_to_ptr.vmem [resolvable:$false] %s1506_s30 }
  0x75   : > { %1192 = vmatpush3.bf16.msra.mxu0 %v1371_v12  ;;  %v1392_v60 = vld [vmem:[#allocation11 + $0x48] sm:$0xff]   ;;  %v1395_v63 = vld [vmem:[#allocation11 + $0x50] sm:$0xff]   ;;  %v1399_v2 = vld [vmem:[#allocation11 + $0x98] sm:$0xff]   ;;  %p1504_p3 = pnand %p1503_p0, %p1916_p1  ;;  %s1508_s7 = scalar_lea.vmem %s1507_s30, 256 }
  0x76   : > { %1193 = vmatprep.subr.bf16.mxu0 %v1372_v13  ;;  %v1394_v61 = vld [vmem:[#allocation11 + $0x8] sm:$0xff]   ;;  %v1397_v1 = vld [vmem:[#allocation11 + $0x10] sm:$0xff]   ;;  %v1398_v3 = vld [vmem:[#allocation11 + $0x58] sm:$0xff]   ;;  %p1509_p9 = scmp.lt.s32.totalorder %s1852_s13, %s1507_s30  ;;  %p1510_p12 = scmp.lt.s32.totalorder %s1508_s7, %s1502_s27 }
  0x77   : > { %1256 = vmatpush3.bf16.msra.mxu1 %v1370_v11  ;;  %v1400_v4 = vld [vmem:[#allocation11 + $0x18] sm:$0xff]   ;;  %v1402_v5 = vld [vmem:[#allocation11 + $0xa0] sm:$0xff]   ;;  %v1405_v8 = vld [vmem:[#allocation11 + $0xa8] sm:$0xff]   ;;  %p1505_p7 = pneg %p1504_p3 }
  0x78   : > { %1257 = vmatprep.subr.bf16.mxu1 %v1579_v0  ;;  %v1401_v6 = vld [vmem:[#allocation11 + $0x60] sm:$0xff]   ;;  %v1404_v9 = vld [vmem:[#allocation11 + $0x68] sm:$0xff]   ;;  %v1407_v11 = vld [vmem:[#allocation11 + $0x70] sm:$0xff]   ;;  %p1511_p2 = por %p1510_p12, %p1509_p9 }
  0x79   : > { %1194 = vmatpush3.bf16.msra.mxu0 %v1374_v15  ;;  %v1403_v7 = vld [vmem:[#allocation11 + $0x20] sm:$0xff]   ;;  %v1406_v10 = vld [vmem:[#allocation11 + $0x28] sm:$0xff]   ;;  %v1408_v12 = vld [vmem:[#allocation11 + $0xb0] sm:$0xff]  }
  0x7a   : > { %1195 = vmatprep.subr.bf16.mxu0 %v1375_v16  ;;  %v1409_v13 = vld [vmem:[#allocation11 + $0x30] sm:$0xff]   ;;  %v1411_v15 = vld [vmem:[#allocation11 + $0xb8] sm:$0xff]   ;;  %vm694_vm11 = vmor %vm692_vm9, %vm693_vm10  ;;  %p1512_p13 = pnand %p1511_p2, %p1505_p7 }
  0x7b   : > { %1258 = vmatpush3.bf16.msra.mxu1 %v1373_v14  ;;  %v1410_v14 = vld [vmem:[#allocation11 + $0x78] sm:$0xff]   ;;  %v1153_v41 = vld [vmem:[%s1899_s5] ss:$0 sm:$0xff] }
  0x7c   : > { %1259 = vmatprep.subr.bf16.mxu1 %v1579_v0  ;;  %v1412_v16 = vld [vmem:[#allocation11 + $0x38] sm:$0xff]  }
  0x7d   : > { %1196 = vmatpush3.bf16.msra.mxu0 %v1377_v18 }
  0x7e   : > { %1197 = vmatprep.subr.bf16.mxu0 %v1378_v19 }
  0x7f   : > { %1260 = vmatpush3.bf16.msra.mxu1 %v1376_v17 }
  0x80   : > { %1261 = vmatprep.subr.bf16.mxu1 %v1579_v0 }
  0x81   : > { %1198 = vmatpush3.bf16.msra.mxu0 %v1380_v21 }
  0x82   : > { %1199 = vmatprep.subr.bf16.mxu0 %v1381_v22  ;;  %v1122_v22 = vld [vmem:[%s1897_s3] ss:$0 sm:$0xff] }
  0x83   : > { %1262 = vmatpush3.bf16.msra.mxu1 %v1379_v20 }
  0x84   : > { %1263 = vmatprep.subr.bf16.mxu1 %v1579_v0 }
  0x85   : > { %1200 = vmatpush3.bf16.msra.mxu0 %v1383_v24 }
  0x86   : > { %1201 = vmatprep.subr.bf16.mxu0 %v1385_v25 }
  0x87   : > { %1264 = vmatpush3.bf16.msra.mxu1 %v1382_v23 }
  0x88   : > { %1269 = vmatprep.subr.bf16.mxu1 %v1579_v0 }
  0x89   : > { %1202 = vmatpush3.bf16.msra.mxu0 %v1386_v26 }
  0x8a   : > { %1218 = vmatprep.subr.bf16.mxu0 %v1389_v57 }
  0xe1   : > { %v320_v28 = vpop.permute.xlu0 %319 }
  0xe2   : > { %v323_v29 = vsel %vm322_vm1, %v312_v27, %v320_v28 }
  0xe3   : > { %v325_v30 = vsel %vm324_vm2, %v323_v29, 0.0 }
  0xe4   : > { %v1185_v31 = vpack.c.bf16 %v325_v30, %v325_v30 }
  0xe6   : > { %v330_v32 = vrot.slane %v1185_v31, 7 }
  0xe8   : > { %v331_v33 = vrot.slane %v330_v32, 4  ;;  %334 = vst [vmem:[#allocation2] sm:$0xe] %v330_v32 }
  0xea   : > { %335 = vst [vmem:[#allocation2 + $0x4] sm:$0x1] %v331_v33 }
  0xef   : > { %v338_v34 = vld [vmem:[#allocation2] sm:$0xf] }
  0xf0   : > { %v359_v35 = vld [vmem:[#allocation2] sm:$0xe]  ;;  %v344_v37 = vshrl.u32 %v338_v34, 16  ;;  %v347_v38 = vshll.u32 %v338_v34, 16 }
  0xf1   : > { %v336_v36 = vld [vmem:[#allocation2] sm:$0xf]  ;;  %v360_v39 = vld [vmem:[#allocation2 + $0x4] sm:$0x1]  ;;  %v1121_v40 = vrot.slane %v359_v35, 9 }
  0xf2   : > { %337 = vst [vmem:[#allocation4] sm:$0xf] %v336_v36  ;;  %v339_v42 = vld [vmem:[#allocation2 + $0x4] sm:$0x1]  ;;  %v346_v43 = vrot.slane %v344_v37, 4  ;;  %v349_v44 = vrot.slane %v347_v38, 5 }
  0xf3   : > { %v368_v45 = vrot.slane %v360_v39, 5  ;;  %v353_v46 = vshll.u32 %v339_v42, 16 }
  0xf4   : > { %v350_v48 = vor.u32 %v349_v44, %v346_v43 }
  0xf5   : > { %v369_v47 = vsel %vm1821_vm7, %v1121_v40, %v368_v45  ;;  %v355_v50 = vrot.slane %v353_v46, 5 }
  0xf6   : > { %371 = vst [vmem:[#allocation4 + $0x8] sm:$0xf] %v369_v47  ;;  %v351_v49 = vrot.slane %v350_v48, 4 }
  0xf8   : > { %v356_v51 = vsel %vm342_vm8, %v351_v49, %v355_v50 }
  0xf9   : > { %358 = vst [vmem:[#allocation4 + $0x4] sm:$0xf] %v356_v51 }
  0xfd   : > { %v1384_v52 = vld [vmem:[#allocation4 + $0x8] ss:$0 sps:$4 sm:$0xff]  }
  0xfe   : > { %1266 = vmatmul.mubr.bf16.vlgmr.msra.gmra.mrb[0].mxu1 %v1384_v52 }
  0xff   : > { %1285 = vmatprep.mubr.msk.bf16.mxu1 %vm1582_vm0, %v1579_v0  ;;  %1270 = vmatpush3.bf16.msra.mxu1 %v1390_v56 }
 0x100   : > { %v372_v53 = vld [vmem:[#allocation4] sm:$0xff]  ;;  %1271 = vmatprep.subr.bf16.mxu1 %v1579_v0 }
 0x101   : > { %v1123_v54 = vcombine.low %v372_v53, %v372_v53  ;;  %v1124_v55 = vcombine.high %v372_v53, %v372_v53 }
 0x103   : > { %616 = vmatprep.mubr.bf16.mxu0 %v1124_v55  ;;  %1272 = vmatpush3.bf16.msra.mxu1 %v1393_v59 }
 0x104   : > { %617 = vmatmul.mubr.bf16.vlgmr.msra.gmra.mrb[0].mxu0 %v1123_v54  ;;  %1273 = vmatprep.subr.bf16.mxu1 %v1579_v0 }
 0x105   : > { %1219 = vmatpush3.bf16.msra.mxu0 %v1391_v58 }
 0x106   : > { %1220 = vmatprep.subr.bf16.mxu0 %v1392_v60 }
 0x107   : > { %1274 = vmatpush3.bf16.msra.mxu1 %v1396_v62 }
 0x108   : > { %1275 = vmatprep.subr.bf16.mxu1 %v1579_v0 }
 0x109   : > { %1221 = vmatpush3.bf16.msra.mxu0 %v1394_v61 }
 0x10a   : > { %1222 = vmatprep.subr.bf16.mxu0 %v1395_v63 }
 0x10b   : > { %1276 = vmatpush3.bf16.msra.mxu1 %v1399_v2 }
 0x10c   : > { %1277 = vmatprep.subr.bf16.mxu1 %v1579_v0 }
 0x10d   : > { %1223 = vmatpush3.bf16.msra.mxu0 %v1397_v1 }
 0x10e   : > { %1224 = vmatprep.subr.bf16.mxu0 %v1398_v3 }
 0x10f   : > { %1278 = vmatpush3.bf16.msra.mxu1 %v1402_v5 }
 0x110   : > { %1279 = vmatprep.subr.bf16.mxu1 %v1579_v0 }
 0x111   : > { %1225 = vmatpush3.bf16.msra.mxu0 %v1400_v4 }
 0x112   : > { %1226 = vmatprep.subr.bf16.mxu0 %v1401_v6 }
 0x113   : > { %1280 = vmatpush3.bf16.msra.mxu1 %v1405_v8 }
 0x114   : > { %1281 = vmatprep.subr.bf16.mxu1 %v1579_v0 }
 0x115   : > { %1227 = vmatpush3.bf16.msra.mxu0 %v1403_v7 }
 0x116   : > { %1228 = vmatprep.subr.bf16.mxu0 %v1404_v9 }
 0x117   : > { %1282 = vmatpush3.bf16.msra.mxu1 %v1408_v12 }
 0x118   : > { %1283 = vmatprep.subr.bf16.mxu1 %v1579_v0 }
 0x119   : > { %1229 = vmatpush3.bf16.msra.mxu0 %v1406_v10 }
 0x11a   : > { %1230 = vmatprep.subr.bf16.mxu0 %v1407_v11 }
 0x11b   : > { %1284 = vmatpush3.bf16.msra.mxu1 %v1411_v15 }
 0x11d   : > { %1231 = vmatpush3.bf16.msra.mxu0 %v1409_v13 }
 0x11e   : > { %1232 = vmatprep.subr.bf16.mxu0 %v1410_v14 }
 0x121   : > { %1233 = vmatpush3.bf16.msra.mxu0 %v1412_v16 }
 0x1d1   : > { %v658_v17 = vpop.f32.mrb[0].mxu1 }
 0x1d2   : > { %v1267_v18 = vpop.f32.mrb[1].mxu1 }
 0x1d3   : > { %v661_v19 = vpop.f32.mrb[2].mxu1 }
 0x1d4   : > { %v1268_v20 = vpop.f32.mrb[3].mxu1 }
 0x1d7   : > { %v1203_v21 = vpop.f32.mrb[0].mxu0 }
 0x1d8   : > { %v1204_v23 = vpop.f32.mrb[1].mxu0 }
 0x1d9   : > { %v1205_v24 = vadd.f32 %v1204_v23, %v1203_v21  ;;  %v1206_v25 = vpop.f32.mrb[2].mxu0 }
 0x1da   : > { %v1207_v26 = vpop.f32.mrb[3].mxu0 }
 0x1db   : > { %v619_v27 = vadd.f32 %v1205_v24, %v1122_v22 }
 0x1dd   : > { %v659_v0 = vadd.f32 %v658_v17, %v619_v27 }
 0x1df   : > { %v664_v28 = vmax.f32 %v659_v0, 0.0 }
 0x1e1   : > { %v1186_v29 = vpack.c.bf16 %v664_v28, %v664_v28 }
 0x1e3   : > { %v670_v30 = vrot.slane %v1186_v29, 6 }
 0x1e5   : > { %v671_v31 = vrot.slane %v670_v30, 4  ;;  %674 = vst [vmem:[#allocation3] sm:$0xc] %v670_v30 }
 0x1e7   : > { %675 = vst [vmem:[#allocation3 + $0x4] sm:$0x3] %v671_v31 }
 0x1ec   : > { %v678_v32 = vld [vmem:[#allocation3] sm:$0xe] }
 0x1ed   : > { %v688_v33 = vld [vmem:[#allocation3] sm:$0xc]  ;;  %v1151_v37 = vrot.slane %v678_v32, 9 }
 0x1ee   : > { %v676_v34 = vld [vmem:[#allocation3] sm:$0xf]  ;;  %v679_v35 = vld [vmem:[#allocation3 + $0x4] sm:$0x1]  ;;  %v1152_v39 = vrot.slane %v688_v33, 10 }
 0x1ef   : > { %677 = vst [vmem:[#allocation5] sm:$0xf] %v676_v34  ;;  %v689_v36 = vld [vmem:[#allocation3 + $0x4] sm:$0x3]  ;;  %v684_v38 = vrot.slane %v679_v35, 5 }
 0x1f0   : > { %v697_v40 = vrot.slane %v689_v36, 6 }
 0x1f1   : > { %v685_v42 = vsel %vm1821_vm7, %v1151_v37, %v684_v38 }
 0x1f2   : > { %v698_v43 = vsel %vm694_vm11, %v1152_v39, %v697_v40  ;;  %687 = vst [vmem:[#allocation5 + $0x4] sm:$0xf] %v685_v42 }
 0x1f3   : > { %700 = vst [vmem:[#allocation5 + $0x8] sm:$0xf] %v698_v43 }
 0x1f9   : > { %v701_v44 = vld [vmem:[#allocation5] sm:$0xff] }
 0x1fa   : > { %v1415_v45 = vld [vmem:[#allocation5 + $0x8] ss:$0 sps:$4 sm:$0xff]   ;;  %v1154_v46 = vcombine.low %v701_v44, %v701_v44  ;;  %v1155_v47 = vcombine.high %v701_v44, %v701_v44 }
 0x1fb   : > { %1286 = vmatmul.mubr.bf16.vlgmr.msra.gmra.mrb[4].mxu1 %v1415_v45 }
 0x1fc   : > { %945 = vmatprep.mubr.bf16.mxu0 %v1155_v47 }
 0x1fd   : > { %946 = vmatmul.mubr.bf16.vlgmr.msra.gmra.mrb[4].mxu0 %v1154_v46 }
 0x2ce   : > { %v987_v48 = vpop.f32.mrb[4].mxu1 }
 0x2cf   : > { %v1287_v49 = vpop.f32.mrb[5].mxu1 }
 0x2d0   : > { %v1234_v50 = vpop.f32.mrb[4].mxu0  ;;  %v990_v51 = vpop.f32.mrb[6].mxu1 }
 0x2d1   : > { %v1235_v52 = vpop.f32.mrb[5].mxu0  ;;  %v1288_v53 = vpop.f32.mrb[7].mxu1 }
 0x2d2   : > { %v1236_v54 = vadd.f32 %v1235_v52, %v1234_v50  ;;  %v1237_v55 = vpop.f32.mrb[6].mxu0 }
 0x2d3   : > { %v1238_v56 = vpop.f32.mrb[7].mxu0 }
 0x2d4   : > { %v948_v57 = vadd.f32 %v1236_v54, %v1153_v41 }
 0x2d6   : > { %v988_v58 = vadd.f32 %v987_v48, %v948_v57 }
 0x2d8   : > { %v993_v59 = vmax.f32 %v988_v58, 0.0 }
 0x2da   : > { %994 = vst [vmem:[%s306_s8] sm:$0xff] %v993_v59 }
 0x2db   : > { %1515 = shalt.err (!%p1512_p13)
}
 0x2dc   : > { %s1516_s18 = scalar_lea.hbm %s1850_s14, 128  ;;  %s1520_s12 = scalar_lea.hbm %s1900_s6, 256 }
 0x2dd   : > { %p1517_p6 = scmp.ne.s32.totalorder %s1850_s14, %s1516_s18  ;;  %p1521_p5 = scmp.lt.u32.totalorder %s1850_s14, %s1900_s6 }
 0x2de   : > { %p1522_p8 = scmp.lt.u32.totalorder %s1520_s12, %s1516_s18  ;;  %p1524_p0 = scmp.lt.u32.totalorder %s1516_s18, %s1850_s14 }
 0x2df   : > { %p1518_p10 = pnand %p1517_p6, %p1916_p1 }
 0x2e0   : > { %p1523_p11 = por %p1522_p8, %p1521_p5 }
 0x2e1   : > { %p1519_p4 = pneg %p1518_p10 }
 0x2e2   : > { %p1525_p3 = por %p1524_p0, %p1523_p11 }
 0x2e4   : > { %p1526_p7 = pnand %p1525_p3, %p1519_p4 }
 0x2e6   : > { %1529 = shalt.err (!%p1526_p7)
}
 0x2e7   : > { %1299 = dma.vmem_to_hbm [thread:$0]  (%p1916_p1), %s1852_s13, 128, %s1850_s14, %s996_s16  }
 0x2e8 PF: > { %s1021_s8 = sand.u32 1, %s1560_s21   ;;  %p1917_p9 = scmp.ne.s32.totalorder %s1905_s28, 0 }
 0x2e9   : > { %p1918_p12 = scmp.ge.s32.totalorder %s1572_s24, 2  ;;  %s1022_s10 = scalar_lea.sflag [#allocation8], %s1021_s8 }
 0x2eb   : > { %p1313_p2 = pnand %p1918_p12, %p1917_p9 }
 0x2ed   : > { %1555 = dma.done.wait (!%p1313_p2), %s1022_s10, 128  }
 0x2ee   : > { %1557 = vsyncadd (!%p1313_p2), %s1022_s10, 4294967168  ;;  %p20_p13 = scmp.ge.s32.totalorder %s1729_s26, 4   ;;  %s1919_s21 = smov %s1564_s22 }
 0x2ef   : > { %s1920_s22 = smov %s1568_s23  ;;  %s1921_s23 = smov %s1745_s11 }
 0x2f0   : > { %s1922_s24 = smov %s1729_s26  ;;  %22 = sbr.rel (!%p20_p13) target bundleno = 6 (0x6), region = 100 }
 0x2f7   :  { %1027 = vsyncpa [#allocation7], 1 }
 0x2f8   :  { %1029 = vsyncpa [#allocation7 + $0x1], 1 }
 0x2f9   :  { %1030 = vsyncpa [#allocation10], 1 }
 0x2fa   :  { %1031 = vsyncpa [#allocation8], 1 }
 0x2fb   :  { %1033 = vsyncpa [#allocation8 + $0x1], 1 }

</bundles_post_ra>
